<compile_context>
chip_gen: v7x
topology: tpu7x:2x2x1
jax: 0.10.0
libtpu: 0.0.40
codegen_flags: <defaults>
</compile_context>

<pallas_src>
import functools

import jax
import jax.numpy as jnp
from jax.experimental import pallas as pl
from jax.experimental.pallas import tpu as pltpu


_MIB = 1024 * 1024
# Scoped-VMEM budget we size blocks against: double-buffered in+out blocks plus compiler
# scratch must fit.  48 MiB is safe on every generation (v7x: 64 MiB physical per TC;
# v5e/v6e: 128 MiB physical, 16/32 MiB default scoped limit that we explicitly raise).
_VMEM_LIMIT_BYTES = 48 * _MIB


def _hw_params():
    """Best-effort (target_input_block_bytes, num_tensorcores_per_chip)."""
    target, cores = 8 * _MIB, 1            # good defaults for v5e / v6e (1 TC per chip)
    try:
        kind = jax.devices()[0].device_kind.lower()
        if "v7" in kind:                   # 2 TCs/chip, ~3.2 TB/s per TC -> bigger blocks
            target, cores = 16 * _MIB, 2
    except Exception:
        pass
    return target, cores


def _choose_tiles(rows, kernel_size, c, itemsize, target_bytes, num_cores):
    """Pick (row_tile, c_tile, pack).

    row_tile counts output windows (each window = kernel_size input rows), c_tile counts
    channels, pack is the dtype's sublane packing (rows per vreg).
    """
    pack = (8 * 4) // itemsize             # 8 for f32, 16 for bf16, 32 for int8/fp8
    align = pack                           # keep output row tiles vreg-dense

    # Channel tile: prefer the full, contiguous C (single fat DMA per block).  Only tile
    # C when even a minimum-height block with full C exceeds the budget, and then take
    # the largest multiple-of-128 divisor of C that fits.
    c_tile = c
    if c % 128 == 0 and align * kernel_size * c * itemsize > target_bytes:
        c_tile = 128
        t = 256
        while t <= c:
            if c % t == 0 and align * kernel_size * t * itemsize <= target_bytes:
                c_tile = t
            t += 128

    # Row tile: largest multiple of `align` whose input block fits the byte budget.
    cap = max(align, (target_bytes // (kernel_size * c_tile * itemsize)) // align * align)

    if rows <= cap:
        row_tile = rows
        if num_cores > 1:
            # Multi-TensorCore part: aim for >= 2 row-steps per core so each core's
            # software pipeline overlaps DMA with compute.  Split rows (contiguous HBM
            # blocks), never channels.
            for parts in (2 * num_cores, num_cores):
                if rows % (parts * align) == 0 and rows // parts >= align:
                    row_tile = rows // parts
                    break
    elif rows % align == 0:
        row_tile = cap
        while rows % row_tile:             # prefer an exact divisor: no ragged edge block
            row_tile -= align
    else:
        # Ragged last block: OOB input rows only feed OOB output rows, which Pallas masks
        # on write-back (every valid window's k source rows are in bounds).
        row_tile = cap
    return row_tile, c_tile, pack


def _pool_kernel_packed(x_ref, o_ref, *, kernel_size, pack):
    # x_ref block: (row_tile * kernel_size, c_tile).  kernel_size % pack == 0, so the
    # reshape below is a pure layout view (vreg tile boundaries line up exactly).
    x = x_ref[...]
    rk, c = x.shape
    row_tile = rk // kernel_size
    x = x.reshape(row_tile, kernel_size, c)
    groups = kernel_size // pack
    # VPU-first: elementwise max across whole vreg-sized sublane groups (VALU slots),
    # then a single sublane reduce (XLU slot) at the very end.
    acc = x[:, 0:pack, :]
    for g in range(1, groups):
        acc = jnp.maximum(acc, x[:, g * pack:(g + 1) * pack, :])
    o_ref[...] = jnp.max(acc, axis=1)


def _pool_kernel_general(x_ref, o_ref):
    # x_ref block: (row_tile, kernel_size, c_tile).  The DMA produced this layout
    # directly (3-D BlockSpec), so no in-kernel relayout copy is needed.
    o_ref[...] = jnp.max(x_ref[...], axis=1)


def grouped_max_pool(x: jax.Array, kernel_size: int, *, channels_last: bool = False,
                     target_in_block_bytes: int | None = None) -> jax.Array:
    """Pallas implementation of GroupedMaxPool.forward.

    Args:
      x: (B, N, C) point features (PointTensor.F layout: batch, points, channels).
      kernel_size: pooling window along the point dimension (stride == kernel_size).
      channels_last: if True and W > 1, return (B, W, C) and skip the HBM round-trip
        transpose used only to match PyTorch's (B, C, W) layout.
      target_in_block_bytes: optional override of the per-block byte budget (testing).

    Returns:
      (B, C) if N // kernel_size == 1 (matching .squeeze(-1)), else (B, C, W)
      (or (B, W, C) with channels_last=True).
    """
    b, n, c_in = x.shape
    assert n % kernel_size == 0, "N must be a multiple of kernel_size"
    w = n // kernel_size
    rows = b * w
    itemsize = jnp.dtype(x.dtype).itemsize

    target, num_cores = _hw_params()
    if target_in_block_bytes is not None:
        target = target_in_block_bytes
    # Cap the input block so double-buffered in+out blocks (2 * (X + X/k)) stay well
    # inside the 48 MiB vmem_limit_bytes with headroom for compiler scratch.
    target = min(target, ((20 * _MIB) * kernel_size) // (kernel_size + 1))

    # Keep the output lane-dense: pad C up to one full 128-lane vreg if needed.
    c = c_in
    x_work = x
    if c_in < 128:
        c = 128
        x_work = jnp.pad(x, ((0, 0), (0, 0), (0, 128 - c_in)))

    row_tile, c_tile, pack = _choose_tiles(rows, kernel_size, c, itemsize, target, num_cores)
    grid = (pl.cdiv(rows, row_tile), pl.cdiv(c, c_tile))

    compiler_params = pltpu.CompilerParams(
        dimension_semantics=("parallel", "parallel"),
        vmem_limit_bytes=_VMEM_LIMIT_BYTES,
    )
    cost = pl.CostEstimate(
        flops=rows * (kernel_size - 1) * c,
        transcendentals=0,
        bytes_accessed=(rows * kernel_size * c + rows * c) * itemsize,
    )
    out_spec = pl.BlockSpec((row_tile, c_tile), lambda r, j: (r, j))
    out_shape = jax.ShapeDtypeStruct((rows, c), x.dtype)

    if kernel_size % pack == 0:
        # Fast path: 2-D row stream; the in-kernel reshape is a free layout view.
        x_in = x_work.reshape(rows * kernel_size, c)
        kernel = functools.partial(_pool_kernel_packed, kernel_size=kernel_size, pack=pack)
        in_spec = pl.BlockSpec((row_tile * kernel_size, c_tile), lambda r, j: (r, j))
    else:
        # General path: present (rows, k, C) so the DMA delivers the 3-D layout directly.
        x_in = x_work.reshape(rows, kernel_size, c)
        kernel = _pool_kernel_general
        in_spec = pl.BlockSpec((row_tile, kernel_size, c_tile), lambda r, j: (r, 0, j))

    pooled = pl.pallas_call(
        kernel,
        out_shape=out_shape,
        grid=grid,
        in_specs=[in_spec],
        out_specs=out_spec,
        compiler_params=compiler_params,
        cost_estimate=cost,
    )(x_in)                                    # (rows, C_padded) == (B*W, C_padded)

    if c != c_in:
        pooled = pooled[:, :c_in]

    if w == 1:
        return pooled.reshape(b, c_in)         # PyTorch: (B, C) after squeeze(-1)
    pooled = pooled.reshape(b, w, c_in)
    if channels_last:
        return pooled                          # (B, W, C): no extra HBM round-trip
    # TODO(synk): this transpose is a separate XLA HBM round trip kept only to match
    # PyTorch's (B, C, W) layout; prefer channels_last=True in callers.
    return jnp.transpose(pooled, (0, 2, 1))


def _ref(x, k):
    b, n, c = x.shape
    w = n // k
    pooled = jnp.max(x.reshape(b, w, k, c), axis=2)      # (B, W, C)
    if w == 1:
        return pooled.reshape(b, c)
    return jnp.transpose(pooled, (0, 2, 1))              # (B, C, W)


if __name__ == "__main__":
    keys = jax.random.split(jax.random.PRNGKey(0), 6)

    # Case 1: intended GroupedMaxPool use -- N == kernel_size -> (B, C); f32 fast path.
    x1 = jax.random.normal(keys[0], (2, 8, 128), dtype=jnp.float32)
    o1 = jax.block_until_ready(grouped_max_pool(x1, 8))
    assert o1.shape == (2, 128) and jnp.array_equal(o1, _ref(x1, 8)), "case 1 mismatch"

    # Case 2: W > 1 streaming path, f32 fast path, PyTorch (B, C, W) layout.
    x2 = jax.random.normal(keys[1], (4, 256, 256), dtype=jnp.float32)
    o2 = jax.block_until_ready(grouped_max_pool(x2, 8))
    assert o2.shape == (4, 256, 32) and jnp.array_equal(o2, _ref(x2, 8)), "case 2 mismatch"

    # Case 3: general 3-D path (kernel_size not a multiple of the sublane packing).
    x3 = jax.random.normal(keys[2], (2, 16, 128), dtype=jnp.float32)
    o3 = jax.block_until_ready(grouped_max_pool(x3, 4))
    assert o3.shape == (2, 128, 4) and jnp.array_equal(o3, _ref(x3, 4)), "case 3 mismatch"

    # Case 4: bf16 -- pack = 16, kernel_size = 16 hits the packed fast path.
    x4 = jax.random.normal(keys[3], (2, 16, 128), dtype=jnp.bfloat16)
    o4 = jax.block_until_ready(grouped_max_pool(x4, 16))
    assert o4.shape == (2, 128) and jnp.array_equal(o4, _ref(x4, 16)), "case 4 mismatch"

    # Case 5: ragged rows (rows = 15, not a multiple of 8) with multiple row blocks,
    # forced via a tiny block budget, to lock in the OOB-masking behaviour.
    x5 = jax.random.normal(keys[4], (5, 24, 128), dtype=jnp.float32)
    o5 = jax.block_until_ready(grouped_max_pool(x5, 8, target_in_block_bytes=32 * 1024))
    assert o5.shape == (5, 128, 3) and jnp.array_equal(o5, _ref(x5, 8)), "case 5 mismatch"

    # Case 6: C < 128 -- padded to a full 128-lane vreg in the wrapper and sliced back.
    x6 = jax.random.normal(keys[5], (2, 8, 64), dtype=jnp.float32)
    o6 = jax.block_until_ready(grouped_max_pool(x6, 8))
    assert o6.shape == (2, 64) and jnp.array_equal(o6, _ref(x6, 8)), "case 6 mismatch"

    print("KERNEL_OK")
</pallas_src>

<mosaic_0001>
module attributes {stable_mosaic.version = 11 : i64} {
  func.func @_pool_kernel_packed(%arg0: i32, %arg1: i32, %arg2: memref<16x128xf32, #tpu.memory_space<vmem>>, %arg3: memref<2x128xf32, #tpu.memory_space<vmem>>) attributes {dimension_semantics = [#tpu.dimension_semantics<parallel>, #tpu.dimension_semantics<parallel>], iteration_bounds = array<i64: 1, 1>, scalar_prefetch = 0 : i64, scratch_operands = 0 : i64, tpu.core_type = #tpu.core_type<tc>, window_params = [{transform_indices = @transform_0, window_bounds = array<i64: 16, 128>}, {transform_indices = @transform_1, window_bounds = array<i64: 2, 128>}]} {
    %c0 = arith.constant 0 : index
    %c0_0 = arith.constant 0 : index
    %0 = vector.load %arg2[%c0, %c0_0] : memref<16x128xf32, #tpu.memory_space<vmem>>, vector<16x128xf32>
    %1 = vector.shape_cast %0 : vector<16x128xf32> to vector<2x8x128xf32>
    %cst = arith.constant dense<0xFF800000> : vector<2x128xf32>
    %2 = vector.multi_reduction <maximumf>, %1, %cst [1] : vector<2x8x128xf32> to vector<2x128xf32>
    %c0_1 = arith.constant 0 : index
    %c0_2 = arith.constant 0 : index
    %3 = vector.load %arg3[%c0_1, %c0_2] : memref<2x128xf32, #tpu.memory_space<vmem>>, vector<2x128xf32>
    tpu.vector_store %arg3[%c0_1, %c0_2], %2 {strides = array<i32>} : memref<2x128xf32, #tpu.memory_space<vmem>>, vector<2x128xf32>,
    return
  }
  func.func @transform_0(%arg0: i32, %arg1: i32) -> (i32, i32) {
    %c0_i32 = arith.constant 0 : i32
    return %arg0, %arg1 : i32, i32
  }
  func.func @transform_1(%arg0: i32, %arg1: i32) -> (i32, i32) {
    %c0_i32 = arith.constant 0 : i32
    return %arg0, %arg1 : i32, i32
  }
}

</mosaic_0001>

<bundles_post_ra>
// kernel: tpu_custom_call.1
= control target key start
LH: loop header
LB: loop body
LE: loop exit
PB: predicated region body
PF: predicated region fallthrough
CT: control target
= control target key end

     0   :  { %6 = vsyncpa [#allocation3], 0  ;;  %s148_s0 = inlined_call_operand.hbm [shape: f32[16,128], index: 0, kind: input, shape index: {}]   ;;  %s149_s1 = inlined_call_operand.hbm [shape: f32[2,128], index: 1, kind: output, shape index: {}]  }
   0x1   :  { %7 = vsyncpa [#allocation4], 0  ;;  %s110_s6 = smov [#allocation2]   ;;  %s62_s10 = scalar_lea.hbm %s148_s0, 256 }
   0x2   :  { %s13_s7 = sshll.u32 %s110_s6, 4  ;;  %p63_p0 = scmp.ne.s32.totalorder %s148_s0, %s62_s10  ;;  %s14_s7 = int_to_ptr.vmem [resolvable:$true] %s13_s7 }
   0x3   :  { %p66_p1 = scmp.lt.u32.totalorder %s62_s10, %s148_s0 }
   0x5   :  { %p68_p2 = pnand %p66_p1, %p63_p0 }
   0x7   :  { %71 = shalt.err (!%p68_p2)
}
   0x8   :  { %s72_s15 = scalar_lea.vmem %s14_s7, 256  ;;  %p77_p4 = scmp.lt.s32.totalorder %s14_s7, %s14_s7 }
   0x9   :  { %p73_p3 = scmp.ne.s32.totalorder %s14_s7, %s72_s15  ;;  %p78_p5 = scmp.lt.s32.totalorder %s72_s15, %s72_s15 }
   0xb   :  { %p79_p6 = por %p78_p5, %p77_p4 }
   0xd   :  { %p80_p7 = pnand %p79_p6, %p73_p3 }
   0xf   :  { %83 = shalt.err (!%p80_p7)
}
  0x10   :  { %s111_s16 = smov 128   ;;  %s112_s17 = smov 8  }
  0x11   :  { %19 = dma.hbm_to_vmem [thread:$0]  %s148_s0, 256, %s14_s7, [#allocation3], %s111_s16, %s111_s16, %s112_s17  }
  0x12   :  { %106 = dma.done.wait [#allocation3], 256  }
  0x13   :  { %107 = vsyncadd [#allocation3], 4294967040  ;;  %v23_v0 = vld [vmem:[#allocation2] sm:$0xff]  ;;  %v24_v1 = vld [vmem:[#allocation2 + $0x8] sm:$0xff]  ;;  %s113_s20 = smov [#allocation5]   ;;  %vm39_vm0 = vcmask 1041409  }
  0x14   :  { %v25_v2 = vrot.slane %v23_v0, 4  ;;  %v31_v3 = vrot.slane %v24_v1, 4  ;;  %s49_s21 = sshll.u32 %s113_s20, 4  ;;  %s50_s21 = int_to_ptr.vmem [resolvable:$true] %s49_s21 }
  0x15   :  { %s84_s0 = scalar_lea.vmem %s50_s21, 32  ;;  %p89_p9 = scmp.lt.s32.totalorder %s50_s21, %s50_s21 }
  0x16   :  { %v26_v4 = vmax.f32 %v23_v0, %v25_v2  ;;  %v32_v5 = vmax.f32 %v24_v1, %v31_v3  ;;  %p85_p8 = scmp.ne.s32.totalorder %s50_s21, %s84_s0  ;;  %p90_p10 = scmp.lt.s32.totalorder %s84_s0, %s84_s0 }
  0x18   :  { %v27_v6 = vrot.slane %v26_v4, 2  ;;  %v33_v7 = vrot.slane %v32_v5, 2  ;;  %p91_p11 = por %p90_p10, %p89_p9 }
  0x1a   :  { %v28_v8 = vmax.f32 %v26_v4, %v27_v6  ;;  %v34_v9 = vmax.f32 %v32_v5, %v33_v7  ;;  %p92_p12 = pnand %p91_p11, %p85_p8 }
  0x1c   :  { %v29_v10 = vrot.slane %v28_v8, 1  ;;  %v35_v11 = vrot.slane %v34_v9, 1 }
  0x1e   :  { %v30_v12 = vmax.f32 %v28_v8, %v29_v10  ;;  %v36_v13 = vmax.f32 %v34_v9, %v35_v11 }
  0x20   :  { %v40_v14 = vsel %vm39_vm0, %v36_v13, %v30_v12 }
  0x21   :  { %42 = vst [vmem:[#allocation5] sm:$0x3] %v40_v14 }
  0x22   :  { %95 = shalt.err (!%p92_p12)
}
  0x23   :  { %s96_s24 = scalar_lea.hbm %s149_s1, 32 }
  0x24   :  { %p97_p13 = scmp.ne.s32.totalorder %s149_s1, %s96_s24  ;;  %p100_p0 = scmp.lt.u32.totalorder %s96_s24, %s149_s1 }
  0x26   :  { %p102_p1 = pnand %p100_p0, %p97_p13 }
  0x28   :  { %105 = shalt.err (!%p102_p1)
}
  0x29   :  { %52 = dma.vmem_to_hbm [thread:$0]  %s50_s21, 32, %s149_s1, [#allocation4]  }
  0x2a   :  { %108 = dma.done.wait [#allocation4], 32  }
  0x2b   :  { %109 = vsyncadd [#allocation4], 4294967264 }
  0x2c   :  { %56 = vsyncpa [#allocation3], 1 }
  0x2d   :  { %57 = vsyncpa [#allocation4], 1 }

</bundles_post_ra>
